<compile_context>
chip_gen: v6e
topology: v6e:2x2x1
jax: 0.10.0
libtpu: 0.0.40
codegen_flags: <defaults>
</compile_context>

<pallas_src>
import functools
import math

import jax
import jax.numpy as jnp
from jax.experimental import pallas as pl
from jax.experimental.pallas import tpu as pltpu


# Scoped-VMEM budget: leaves headroom below v7x's 64 MiB physical VMEM while
# raising the 16/32 MiB scoped defaults on v5e/v6e.
_VMEM_LIMIT = 48 * 1024 * 1024


def _cparams(dimension_semantics):
    return pltpu.CompilerParams(dimension_semantics=dimension_semantics,
                                vmem_limit_bytes=_VMEM_LIMIT)


def _pick_tile(dim, max_tile, min_tile):
    """Largest tile <= max_tile (halving down to min_tile) that divides dim, else full dim."""
    if dim <= max_tile:
        return dim
    t = max_tile
    while t > min_tile and dim % t:
        t //= 2
    return t if dim % t == 0 else dim


# ------------------------------ linear kernels ------------------------------

def _linear_kernel(x_ref, w_ref, b_ref, o_ref, acc_ref, *, activation):
    k = pl.program_id(2)

    @pl.when(k == 0)
    def _():
        acc_ref[...] = jnp.zeros_like(acc_ref)

    acc_ref[...] += jnp.dot(x_ref[...], w_ref[...],
                            preferred_element_type=jnp.float32)

    @pl.when(k == pl.num_programs(2) - 1)
    def _():
        y = acc_ref[...] + b_ref[...]
        if activation == "tanh":
            y = jnp.tanh(y)
        elif activation == "gelu":
            # TODO(synk): HF Longformer uses exact (erf) GELU; tanh approximation used here.
            y = 0.5 * y * (1.0 + jnp.tanh(
                0.7978845608028654 * (y + 0.044715 * y * y * y)))
        o_ref[...] = y.astype(o_ref.dtype)


def linear(x, w, b, activation="none", out_dtype=jnp.bfloat16,
           tm_max=256, tn_max=256, tk_max=512):
    """y = act(x @ w + b). x:(M,K) bf16, w:(K,N) bf16, b:(N,) f32."""
    M, K = x.shape
    N = w.shape[1]
    tm = _pick_tile(M, tm_max, 8)
    tn = _pick_tile(N, tn_max, 128)
    tk = _pick_tile(K, tk_max, 128)
    grid = (M // tm, N // tn, K // tk)
    return pl.pallas_call(
        functools.partial(_linear_kernel, activation=activation),
        grid=grid,
        in_specs=[
            pl.BlockSpec((tm, tk), lambda m, n, k: (m, k)),
            pl.BlockSpec((tk, tn), lambda m, n, k: (k, n)),
            pl.BlockSpec((1, tn), lambda m, n, k: (0, n)),
        ],
        out_specs=pl.BlockSpec((tm, tn), lambda m, n, k: (m, n)),
        out_shape=jax.ShapeDtypeStruct((M, N), out_dtype),
        scratch_shapes=[pltpu.VMEM((tm, tn), jnp.float32)],
        compiler_params=_cparams(("parallel", "parallel", "arbitrary")),
    )(x, w, b.reshape(1, N).astype(jnp.float32))


def _linear_res_ln_kernel(x_ref, w_ref, b_ref, res_ref, g_ref, bb_ref,
                          o_ref, acc_ref, *, eps):
    k = pl.program_id(1)

    @pl.when(k == 0)
    def _():
        acc_ref[...] = jnp.zeros_like(acc_ref)

    acc_ref[...] += jnp.dot(x_ref[...], w_ref[...],
                            preferred_element_type=jnp.float32)

    @pl.when(k == pl.num_programs(1) - 1)
    def _():
        y = acc_ref[...] + b_ref[...] + res_ref[...].astype(jnp.float32)
        mean = jnp.mean(y, axis=-1, keepdims=True)
        c = y - mean
        var = jnp.mean(c * c, axis=-1, keepdims=True)
        inv = jax.lax.rsqrt(var + eps)
        # fuse gamma into the inverse-stddev multiply
        o_ref[...] = (c * (inv * g_ref[...]) + bb_ref[...]).astype(o_ref.dtype)


def linear_residual_layernorm(x, w, b, residual, gamma, beta, eps=1e-5,
                              out_dtype=jnp.bfloat16, tm_max=256, tk_max=512):
    """LayerNorm(residual + x @ w + b); the output feature dim stays whole per block."""
    M, K = x.shape
    N = w.shape[1]
    tm = _pick_tile(M, tm_max, 8)
    tk = _pick_tile(K, tk_max, 128)
    grid = (M // tm, K // tk)
    return pl.pallas_call(
        functools.partial(_linear_res_ln_kernel, eps=eps),
        grid=grid,
        in_specs=[
            pl.BlockSpec((tm, tk), lambda m, k: (m, k)),
            pl.BlockSpec((tk, N), lambda m, k: (k, 0)),
            pl.BlockSpec((1, N), lambda m, k: (0, 0)),
            pl.BlockSpec((tm, N), lambda m, k: (m, 0)),
            pl.BlockSpec((1, N), lambda m, k: (0, 0)),
            pl.BlockSpec((1, N), lambda m, k: (0, 0)),
        ],
        out_specs=pl.BlockSpec((tm, N), lambda m, k: (m, 0)),
        out_shape=jax.ShapeDtypeStruct((M, N), out_dtype),
        scratch_shapes=[pltpu.VMEM((tm, N), jnp.float32)],
        compiler_params=_cparams(("parallel", "arbitrary")),
    )(x, w, b.reshape(1, N).astype(jnp.float32), residual,
      gamma.reshape(1, N).astype(jnp.float32),
      beta.reshape(1, N).astype(jnp.float32))


def _layernorm_kernel(x_ref, g_ref, b_ref, o_ref, *, eps):
    x = x_ref[...].astype(jnp.float32)
    mean = jnp.mean(x, axis=-1, keepdims=True)
    c = x - mean
    var = jnp.mean(c * c, axis=-1, keepdims=True)
    inv = jax.lax.rsqrt(var + eps)
    o_ref[...] = (c * (inv * g_ref[...]) + b_ref[...]).astype(o_ref.dtype)


def layer_norm(x, gamma, beta, eps=1e-5, out_dtype=jnp.bfloat16, tm_max=256):
    M, H = x.shape
    tm = _pick_tile(M, tm_max, 8)
    return pl.pallas_call(
        functools.partial(_layernorm_kernel, eps=eps),
        grid=(M // tm,),
        in_specs=[
            pl.BlockSpec((tm, H), lambda m: (m, 0)),
            pl.BlockSpec((1, H), lambda m: (0, 0)),
            pl.BlockSpec((1, H), lambda m: (0, 0)),
        ],
        out_specs=pl.BlockSpec((tm, H), lambda m: (m, 0)),
        out_shape=jax.ShapeDtypeStruct((M, H), out_dtype),
        compiler_params=_cparams(("parallel",)),
    )(x, gamma.reshape(1, H).astype(jnp.float32),
      beta.reshape(1, H).astype(jnp.float32))


# ----------------------------- attention kernel ------------------------------

def _attention_kernel(q_ref, k_ref, v_ref, keymask_ref, globkey_ref, globrow_ref,
                      ctx_ref, probs_ref, *, scale, window, head_dim):
    # q_ref:        (1, tq, hb*Dh)  query rows for this (batch, head-block, q-tile)
    # k_ref/v_ref:  (1, S,  hb*Dh)  full key/value rows for this (batch, head-block)
    # keymask/globkey: (1, 1, S); globrow: (1, tq, 1)
    # ctx_ref:      (1, tq, hb*Dh)  written directly in (B, S, H) layout
    # probs_ref:    (1, hb, tq, S)  bf16
    tq = q_ref.shape[1]
    S = k_ref.shape[1]
    hd = q_ref.shape[2]
    hb = hd // head_dim

    # Rebuild the Longformer sliding-window OR global mask in-kernel from O(S)
    # vectors (no dense (B,1,S,S) bias tensor in HBM).
    q0 = pl.program_id(2) * tq
    rows = q0 + jax.lax.broadcasted_iota(jnp.int32, (tq, S), 0)
    cols = jax.lax.broadcasted_iota(jnp.int32, (tq, S), 1)
    band = (cols >= rows - window) & (cols <= rows + window)
    key_ok = keymask_ref[0] > 0.5      # (1, S)
    glob_k = globkey_ref[0] > 0.5      # (1, S)
    glob_q = globrow_ref[0] > 0.5      # (tq, 1)
    allowed = (band | glob_k | glob_q) & key_ok   # (tq, S)

    qb = q_ref[0]     # (tq, hd) bf16
    kb = k_ref[0]     # (S,  hd) bf16
    vb = v_ref[0]     # (S,  hd) bf16

    ctx_parts = []
    for h in range(hb):                # static unroll over packed heads
        lo = h * head_dim
        hi = lo + head_dim
        qh = qb[:, lo:hi]
        kh = kb[:, lo:hi]
        vh = vb[:, lo:hi]
        s = jax.lax.dot_general(qh, kh, (((1,), (1,)), ((), ())),
                                preferred_element_type=jnp.float32)
        s = jnp.where(allowed, s * scale, -1e9)
        m = jnp.max(s, axis=-1, keepdims=True)
        e = jnp.exp(s - m)
        p = e * pl.reciprocal(jnp.sum(e, axis=-1, keepdims=True), approx=True)
        probs_ref[0, h] = p.astype(probs_ref.dtype)
        ctx_parts.append(jnp.dot(p.astype(vb.dtype), vh,
                                 preferred_element_type=jnp.float32))
    # single lane-dense (>=128 wide) store of the packed heads
    ctx_ref[0] = jnp.concatenate(ctx_parts, axis=-1).astype(ctx_ref.dtype)


def attention(qkv, key_mask, glob_key, glob_row, num_heads, head_dim, window,
              q_tile_max=128, probs_dtype=jnp.bfloat16):
    """Masked (sliding-window + global) softmax attention over a fused QKV activation.

    qkv: (B, S, 3H) bf16 laid out as [q | k | v] along the last dim.
    Returns ctx (B, S, H) bf16 and probs (B, nH, S, S) in probs_dtype.
    """
    # TODO(synk): a flash/online-softmax KV-tiled variant that skips out-of-band KV
    # tiles should be used when output_attentions is not required; the dense probs
    # output mandated by the module forces O(S^2) writeback here (q-tiled only).
    B, S, three_h = qkv.shape
    H = three_h // 3
    # Pack heads so matmul operands and the ctx store are >=128 lanes wide.
    hb = 128 // head_dim if (head_dim <= 128 and 128 % head_dim == 0) else 1
    while num_heads % hb:
        hb -= 1
    hd = hb * head_dim
    nHb = num_heads // hb
    tq = _pick_tile(S, q_tile_max, 8)
    scale = 1.0 / math.sqrt(head_dim)
    grid = (B, nHb, S // tq)

    q_spec = pl.BlockSpec((1, tq, hd), lambda b, h, qi: (b, qi, h))
    k_spec = pl.BlockSpec((1, S, hd), lambda b, h, qi: (b, 0, nHb + h))
    v_spec = pl.BlockSpec((1, S, hd), lambda b, h, qi: (b, 0, 2 * nHb + h))
    keymask_spec = pl.BlockSpec((1, 1, S), lambda b, h, qi: (b, 0, 0))
    globkey_spec = pl.BlockSpec((1, 1, S), lambda b, h, qi: (b, 0, 0))
    globrow_spec = pl.BlockSpec((1, tq, 1), lambda b, h, qi: (b, qi, 0))
    ctx_spec = pl.BlockSpec((1, tq, hd), lambda b, h, qi: (b, qi, h))
    probs_spec = pl.BlockSpec((1, hb, tq, S), lambda b, h, qi: (b, h, qi, 0))

    return pl.pallas_call(
        functools.partial(_attention_kernel, scale=scale, window=window,
                          head_dim=head_dim),
        grid=grid,
        in_specs=[q_spec, k_spec, v_spec, keymask_spec, globkey_spec, globrow_spec],
        out_specs=(ctx_spec, probs_spec),
        out_shape=(jax.ShapeDtypeStruct((B, S, H), jnp.bfloat16),
                   jax.ShapeDtypeStruct((B, num_heads, S, S), probs_dtype)),
        compiler_params=_cparams(("parallel", "parallel", "parallel")),
    )(qkv, qkv, qkv, key_mask, glob_key, glob_row)


# ------------------------- parameters (synthetic) ---------------------------

def init_params(key, cfg):
    H, I = cfg["hidden"], cfg["intermediate"]

    def dense(k, fan_in, fan_out):
        w = (0.02 * jax.random.normal(k, (fan_in, fan_out), jnp.float32)).astype(jnp.bfloat16)
        return w, jnp.zeros((fan_out,), jnp.float32)

    keys = jax.random.split(key, 5 + cfg["num_layers"])
    params = {
        "word_emb": 0.02 * jax.random.normal(keys[0], (cfg["vocab"], H), jnp.float32),
        "pos_emb": 0.02 * jax.random.normal(keys[1], (cfg["max_pos"], H), jnp.float32),
        "tok_emb": 0.02 * jax.random.normal(keys[2], (1, H), jnp.float32),
        "emb_ln_g": jnp.ones((H,), jnp.float32),
        "emb_ln_b": jnp.zeros((H,), jnp.float32),
        "layers": [],
    }
    for l in range(cfg["num_layers"]):
        lk = jax.random.split(keys[3 + l], 4)
        qkv_w, qkv_b = dense(lk[0], H, 3 * H)      # fused q|k|v projection
        ow, ob = dense(lk[1], H, H)
        iw, ib = dense(lk[2], H, I)
        fw, fb = dense(lk[3], I, H)
        params["layers"].append({
            "qkv_w": qkv_w, "qkv_b": qkv_b,
            "o_w": ow, "o_b": ob,
            "ln1_g": jnp.ones((H,), jnp.float32), "ln1_b": jnp.zeros((H,), jnp.float32),
            "i_w": iw, "i_b": ib, "f_w": fw, "f_b": fb,
            "ln2_g": jnp.ones((H,), jnp.float32), "ln2_b": jnp.zeros((H,), jnp.float32),
        })
    pw, pb = dense(keys[3 + cfg["num_layers"]], H, H)
    cw, cb = dense(keys[4 + cfg["num_layers"]], H, cfg["num_classes"])
    params["pooler_w"], params["pooler_b"] = pw, pb
    params["fc_w"], params["fc_b"] = cw, cb
    return params


# ------------------------------ forward pass --------------------------------

def longformer_classifier_forward(params, input_ids, attention_mask,
                                  global_attention_mask, cfg, num_global_tokens):
    B, S = input_ids.shape
    H = cfg["hidden"]
    nH = cfg["num_heads"]
    Dh = H // nH
    w = cfg["attention_window"] // 2                                    # one-sided window

    # --- embeddings (gathers stay in XLA; LayerNorm runs in a Pallas kernel) ---
    word = jnp.take(params["word_emb"], input_ids, axis=0)              # (B,S,H) f32
    pos_ids = jnp.arange(S, dtype=jnp.int32) + 2                        # RoBERTa-style offset
    pos = jnp.take(params["pos_emb"], pos_ids, axis=0)[None, :, :]
    tok = params["tok_emb"][0][None, None, :]
    h2d = (word + pos + tok).reshape(B * S, H)
    x2d = layer_norm(h2d, params["emb_ln_g"], params["emb_ln_b"])       # bf16
    # embedding / attention / hidden dropouts are identity in eval mode.

    # O(S) mask vectors; the band|global mask is rebuilt inside the attention kernel.
    key_mask = attention_mask.astype(jnp.float32).reshape(B, 1, S)
    glob_key = global_attention_mask.astype(jnp.float32).reshape(B, 1, S)
    glob_row = global_attention_mask.astype(jnp.float32).reshape(B, S, 1)

    attentions = []
    global_attentions = []
    for lp in params["layers"]:
        qkv = linear(x2d, lp["qkv_w"], lp["qkv_b"]).reshape(B, S, 3 * H)
        ctx, probs = attention(qkv, key_mask, glob_key, glob_row, nH, Dh, window=w)
        x2d = linear_residual_layernorm(ctx.reshape(B * S, H), lp["o_w"], lp["o_b"],
                                        residual=x2d,
                                        gamma=lp["ln1_g"], beta=lp["ln1_b"])
        inter = linear(x2d, lp["i_w"], lp["i_b"], activation="gelu")
        x2d = linear_residual_layernorm(inter, lp["f_w"], lp["f_b"],
                                        residual=x2d,
                                        gamma=lp["ln2_g"], beta=lp["ln2_b"])
        attentions.append(probs)
        # TODO(synk): HF Longformer emits banded local probs (B,heads,S,window+1) and uses
        # separate global Q/K/V projections; dense masked-softmax probs returned instead.
        global_attentions.append(probs[:, :, :, :num_global_tokens])

    cls = x2d.reshape(B, S, H)[:, 0, :]                                 # (B, H)
    pooled = linear(cls, params["pooler_w"], params["pooler_b"], activation="tanh")
    # self.dropout(pooled_output) with p=0.3 is identity in eval mode.
    logits = linear(pooled, params["fc_w"], params["fc_b"], out_dtype=jnp.float32)
    return logits, tuple(attentions), tuple(global_attentions)


# ---------------------------------- main -------------------------------------

if __name__ == "__main__":
    cfg = dict(vocab=64, hidden=128, num_heads=2, intermediate=256,
               num_layers=2, max_pos=64, attention_window=8, num_classes=3)
    B, S = 2, 16

    key = jax.random.PRNGKey(0)
    pkey, dkey = jax.random.split(key)
    params = init_params(pkey, cfg)

    input_ids = jax.random.randint(dkey, (B, S), 0, cfg["vocab"], dtype=jnp.int32)
    attention_mask = jnp.ones((B, S), jnp.int32)
    global_attention_mask = jnp.zeros((B, S), jnp.int32).at[:, 0].set(1)   # CLS is global

    logits, attns, gattns = longformer_classifier_forward(
        params, input_ids, attention_mask, global_attention_mask, cfg,
        num_global_tokens=1)
    jax.block_until_ready((logits, attns, gattns))

    assert logits.shape == (B, cfg["num_classes"])
    assert logits.dtype == jnp.float32
    assert len(attns) == cfg["num_layers"]
    assert attns[0].shape == (B, cfg["num_heads"], S, S)
    assert gattns[0].shape == (B, cfg["num_heads"], S, 1)
    print("KERNEL_OK")
</pallas_src>

<mosaic_0001>
module attributes {stable_mosaic.version = 11 : i64} {
  func.func @_layernorm_kernel(%arg0: i32, %arg1: memref<32x128xf32, #tpu.memory_space<vmem>>, %arg2: memref<1x128xf32, #tpu.memory_space<vmem>>, %arg3: memref<1x128xf32, #tpu.memory_space<vmem>>, %arg4: memref<32x128xbf16, #tpu.memory_space<vmem>>) attributes {dimension_semantics = [#tpu.dimension_semantics<parallel>], iteration_bounds = array<i64: 1>, scalar_prefetch = 0 : i64, scratch_operands = 0 : i64, tpu.core_type = #tpu.core_type<tc>, window_params = [{transform_indices = @transform_0, window_bounds = array<i64: 32, 128>}, {pipeline_mode = #tpu.pipeline_mode<synchronous>, transform_indices = @transform_1, window_bounds = array<i64: 1, 128>}, {pipeline_mode = #tpu.pipeline_mode<synchronous>, transform_indices = @transform_2, window_bounds = array<i64: 1, 128>}, {transform_indices = @transform_3, window_bounds = array<i64: 32, 128>}]} {
    %c0 = arith.constant 0 : index
    %c0_0 = arith.constant 0 : index
    %0 = vector.load %arg1[%c0, %c0_0] : memref<32x128xf32, #tpu.memory_space<vmem>>, vector<32x128xf32>
    %cst = arith.constant dense<0.000000e+00> : vector<32xf32>
    %1 = vector.multi_reduction <add>, %0, %cst [1] : vector<32x128xf32> to vector<32xf32>
    %2 = vector.shape_cast %1 : vector<32xf32> to vector<32x1xf32>
    %cst_1 = arith.constant 1.280000e+02 : f32
    %3 = vector.broadcast %cst_1 : f32 to vector<32x1xf32>
    %4 = arith.divf %2, %3 : vector<32x1xf32>
    %5 = vector.broadcast %4 : vector<32x1xf32> to vector<32x128xf32>
    %6 = arith.subf %0, %5 : vector<32x128xf32>
    %7 = arith.mulf %6, %6 : vector<32x128xf32>
    %cst_2 = arith.constant dense<0.000000e+00> : vector<32xf32>
    %8 = vector.multi_reduction <add>, %7, %cst_2 [1] : vector<32x128xf32> to vector<32xf32>
    %9 = vector.shape_cast %8 : vector<32xf32> to vector<32x1xf32>
    %cst_3 = arith.constant 1.280000e+02 : f32
    %10 = vector.broadcast %cst_3 : f32 to vector<32x1xf32>
    %11 = arith.divf %9, %10 : vector<32x1xf32>
    %cst_4 = arith.constant 9.99999974E-6 : f32
    %12 = vector.broadcast %cst_4 : f32 to vector<32x1xf32>
    %13 = arith.addf %11, %12 : vector<32x1xf32>
    %14 = math.rsqrt %13 : vector<32x1xf32>
    %c0_5 = arith.constant 0 : index
    %c0_6 = arith.constant 0 : index
    %15 = vector.load %arg2[%c0_5, %c0_6] : memref<1x128xf32, #tpu.memory_space<vmem>>, vector<1x128xf32>
    %16 = vector.broadcast %14 : vector<32x1xf32> to vector<32x128xf32>
    %17 = vector.broadcast %15 : vector<1x128xf32> to vector<32x128xf32>
    %18 = arith.mulf %16, %17 : vector<32x128xf32>
    %19 = arith.mulf %6, %18 : vector<32x128xf32>
    %c0_7 = arith.constant 0 : index
    %c0_8 = arith.constant 0 : index
    %20 = vector.load %arg3[%c0_7, %c0_8] : memref<1x128xf32, #tpu.memory_space<vmem>>, vector<1x128xf32>
    %21 = vector.broadcast %20 : vector<1x128xf32> to vector<32x128xf32>
    %22 = arith.addf %19, %21 : vector<32x128xf32>
    %23 = arith.truncf %22 : vector<32x128xf32> to vector<32x128xbf16>
    %c0_9 = arith.constant 0 : index
    %c0_10 = arith.constant 0 : index
    %24 = vector.load %arg4[%c0_9, %c0_10] : memref<32x128xbf16, #tpu.memory_space<vmem>>, vector<32x128xbf16>
    tpu.vector_store %arg4[%c0_9, %c0_10], %23 {strides = array<i32>} : memref<32x128xbf16, #tpu.memory_space<vmem>>, vector<32x128xbf16>,
    return
  }
  func.func @transform_0(%arg0: i32) -> (i32, i32) {
    %c0_i32 = arith.constant 0 : i32
    %c0_i32_0 = arith.constant 0 : i32
    return %arg0, %c0_i32 : i32, i32
  }
  func.func @transform_1(%arg0: i32) -> (i32, i32) {
    %c0_i32 = arith.constant 0 : i32
    %c0_i32_0 = arith.constant 0 : i32
    %c0_i32_1 = arith.constant 0 : i32
    return %c0_i32, %c0_i32_0 : i32, i32
  }
  func.func @transform_2(%arg0: i32) -> (i32, i32) {
    %c0_i32 = arith.constant 0 : i32
    %c0_i32_0 = arith.constant 0 : i32
    %c0_i32_1 = arith.constant 0 : i32
    return %c0_i32, %c0_i32_0 : i32, i32
  }
  func.func @transform_3(%arg0: i32) -> (i32, i32) {
    %c0_i32 = arith.constant 0 : i32
    %c0_i32_0 = arith.constant 0 : i32
    return %arg0, %c0_i32 : i32, i32
  }
}

</mosaic_0001>

<bundles_post_ra>
// kernel: tpu_custom_call.1
= control target key start
LH: loop header
LB: loop body
LE: loop exit
PB: predicated region body
PF: predicated region fallthrough
CT: control target
= control target key end

     0   :  { %8 = vsyncpa [#allocation3], 0  ;;  %s254_s0 = inlined_call_operand.hbm [shape: f32[32,128], index: 0, kind: input, shape index: {}]   ;;  %s255_s1 = inlined_call_operand.vmem [shape: f32[1,128], index: 1, kind: input, shape index: {}]   ;;  %s256_s2 = inlined_call_operand.vmem [shape: f32[1,128], index: 2, kind: input, shape index: {}]   ;;  %s257_s3 = inlined_call_operand.hbm [shape: bf16[32,128], index: 3, kind: output, shape index: {}]  }
   0x1   :  { %9 = vsyncpa [#allocation4], 0  ;;  %s216_s12 = smov [#allocation2]  }
   0x2   :  { %s15_s13 = sshll.u32 %s216_s12, 4  ;;  %s16_s13 = int_to_ptr.vmem [resolvable:$true] %s15_s13 }
   0x3   :  { %s180_s14 = scalar_lea.vmem %s16_s13, 512  ;;  %p185_p1 = scmp.lt.s32.totalorder %s16_s13, %s16_s13 }
   0x4   :  { %p181_p0 = scmp.ne.s32.totalorder %s16_s13, %s180_s14  ;;  %p186_p2 = scmp.lt.s32.totalorder %s180_s14, %s180_s14 }
   0x6   :  { %p187_p3 = por %p186_p2, %p185_p1 }
   0x8   :  { %p188_p4 = pnand %p187_p3, %p181_p0 }
   0xa   :  { %191 = shalt.err (!%p188_p4)
}
   0xb   :  { %s217_s15 = smov 128   ;;  %s218_s16 = smov 8  }
   0xc   :  { %21 = dma.hbm_to_vmem [thread:$0]  %s254_s0, 512, %s16_s13, [#allocation3], %s217_s15, %s217_s15, %s218_s16  }
   0xd   :  { %212 = dma.done.wait [#allocation3], 512  }
   0xe   :  { %213 = vsyncadd [#allocation3], 4294966784  ;;  %v29_v0 = vld [vmem:[#allocation2] sm:$0xff]  ;;  %v31_v1 = vld [vmem:[#allocation2 + $0x10] sm:$0xff] }
   0xf   :  { %33 = vadd.xlane.f32.xlu0 %v29_v0  ;;  %37 = vadd.xlane.f32.xlu1 %v31_v1  ;;  %v30_v2 = vld [vmem:[#allocation2 + $0x8] sm:$0xff]  ;;  %v32_v3 = vld [vmem:[#allocation2 + $0x18] sm:$0xff]  ;;  %v137_v32 = vld [vmem:[%s255_s1] ss:$0 sm:$0xff]  ;;  %s219_s1 = smov [#allocation5]  }
  0x10   :  { %v138_v40 = vld [vmem:[%s256_s2] ss:$0 sm:$0xff]  ;;  %s125_s22 = sshll.u32 %s219_s1, 4  ;;  %s126_s22 = int_to_ptr.vmem [resolvable:$true] %s125_s22 }
  0x11   :  { %s192_s23 = scalar_lea.vmem %s126_s22, 256  ;;  %p197_p6 = scmp.lt.s32.totalorder %s126_s22, %s126_s22 }
  0x12   :  { %p193_p5 = scmp.ne.s32.totalorder %s126_s22, %s192_s23  ;;  %p198_p7 = scmp.lt.s32.totalorder %s192_s23, %s192_s23 }
  0x13   :  { %35 = vadd.xlane.f32.xlu0 %v30_v2  ;;  %39 = vadd.xlane.f32.xlu1 %v32_v3 }
  0x14   :  { %p199_p8 = por %p198_p7, %p197_p6 }
  0x16   :  { %p200_p9 = pnand %p199_p8, %p193_p5 }
  0x98   :  { %v34_v4 = vpop.xlane.xlu0 %33  ;;  %v38_v5 = vpop.xlane.xlu1 %37 }
  0x99   :  { %v42_v6 = vmul.f32 0.0078125, %v34_v4  ;;  %v44_v7 = vmul.f32 0.0078125, %v38_v5 }
  0x9b   :  { %v46_v8 = vsub.f32 %v29_v0, %v42_v6  ;;  %v48_v9 = vsub.f32 %v31_v1, %v44_v7 }
  0x9c   :  { %v36_v10 = vpop.xlane.xlu0 %35  ;;  %v40_v11 = vpop.xlane.xlu1 %39 }
  0x9d   :  { %v43_v12 = vmul.f32 0.0078125, %v36_v10  ;;  %v50_v13 = vmul.f32 %v46_v8, %v46_v8  ;;  %v45_v14 = vmul.f32 0.0078125, %v40_v11  ;;  %v52_v17 = vmul.f32 %v48_v9, %v48_v9 }
  0x9f   :  { %v47_v15 = vsub.f32 %v30_v2, %v43_v12  ;;  %54 = vadd.xlane.f32.xlu0 %v50_v13  ;;  %v49_v16 = vsub.f32 %v32_v3, %v45_v14 }
  0xa1   :  { %v51_v18 = vmul.f32 %v47_v15, %v47_v15  ;;  %v53_v19 = vmul.f32 %v49_v16, %v49_v16 }
  0xa3   :  { %58 = vadd.xlane.f32.xlu0 %v52_v17  ;;  %56 = vadd.xlane.f32.xlu1 %v51_v18 }
  0xa7   :  { %60 = vadd.xlane.f32.xlu1 %v53_v19 }
 0x128   :  { %v55_v20 = vpop.xlane.xlu0 %54 }
 0x129   :  { %v62_v21 = vmul.f32 0.0078125, %v55_v20 }
 0x12b   :  { %v66_v22 = vadd.f32 1e-05, %v62_v21 }
 0x12c   :  { %v57_v23 = vpop.xlane.xlu1 %56  ;;  %v59_v24 = vpop.xlane.xlu0 %58 }
 0x12d   :  { %164 = vrsqrt.f32 %v66_v22  ;;  %v63_v25 = vmul.f32 0.0078125, %v57_v23  ;;  %v64_v26 = vmul.f32 0.0078125, %v59_v24 }
 0x12f   :  { %v67_v27 = vadd.f32 1e-05, %v63_v25  ;;  %v68_v28 = vadd.f32 1e-05, %v64_v26 }
 0x130   :  { %v61_v29 = vpop.xlane.xlu1 %60 }
 0x131   :  { %166 = vrsqrt.f32 %v67_v27  ;;  %v65_v30 = vmul.f32 0.0078125, %v61_v29 }
 0x132   :  { %168 = vrsqrt.f32 %v68_v28 }
 0x133   :  { %v69_v31 = vadd.f32 1e-05, %v65_v30 }
 0x135   :  { %170 = vrsqrt.f32 %v69_v31 }
 0x13a   :  { %v165_v33 = vpop.eup %164 }
 0x13b   :  { %v81_v34 = vmul.f32 %v165_v33, %v137_v32 }
 0x13d   :  { %v85_v38 = vmul.f32 %v81_v34, %v46_v8 }
 0x13e   :  { %v167_v35 = vpop.eup %166 }
 0x13f   :  { %v169_v36 = vpop.eup %168  ;;  %v82_v37 = vmul.f32 %v167_v35, %v137_v32  ;;  %v96_v45 = vadd.f32 %v138_v40, %v85_v38 }
 0x140   :  { %v83_v39 = vmul.f32 %v169_v36, %v137_v32 }
 0x141   :  { %v86_v41 = vmul.f32 %v82_v37, %v47_v15 }
 0x142   :  { %v171_v42 = vpop.eup %170  ;;  %v87_v44 = vmul.f32 %v83_v39, %v48_v9 }
 0x143   :  { %v84_v43 = vmul.f32 %v171_v42, %v137_v32  ;;  %v97_v46 = vadd.f32 %v138_v40, %v86_v41 }
 0x144   :  { %v98_v49 = vadd.f32 %v138_v40, %v87_v44 }
 0x145   :  { %v88_v47 = vmul.f32 %v84_v43, %v49_v16  ;;  %v150_v48 = vpack.c.bf16 %v97_v46, %v96_v45 }
 0x147   :  { %v99_v50 = vadd.f32 %v138_v40, %v88_v47  ;;  %151 = vst [vmem:[#allocation5] sm:$0xff] %v150_v48  }
 0x149   :  { %v155_v51 = vpack.c.bf16 %v99_v50, %v98_v49 }
 0x14b   :  { %157 = vst [vmem:[#allocation5 + $0x8] sm:$0xff] %v155_v51  }
 0x14c   :  { %203 = shalt.err (!%p200_p9)
}
 0x14d   :  { %s220_s2 = smov 64   ;;  %s221_s24 = smov 4  }
 0x14e   :  { %131 = dma.vmem_to_hbm [thread:$0]  %s126_s22, 256, %s257_s3, [#allocation4], %s220_s2, %s220_s2, %s221_s24  }
 0x14f   :  { %214 = dma.done.wait [#allocation4], 256  }
 0x150   :  { %215 = vsyncadd [#allocation4], 4294967040 }
 0x151   :  { %135 = vsyncpa [#allocation3], 1 }
 0x152   :  { %136 = vsyncpa [#allocation4], 1 }

</bundles_post_ra>
